<compile_context>
chip_gen: v7x
topology: tpu7x:2x2x1
jax: 0.10.0
libtpu: 0.0.40
codegen_flags: <defaults>
</compile_context>

<pallas_src>
import math

import jax
import jax.numpy as jnp
from jax.experimental import pallas as pl
from jax.experimental.pallas import tpu as pltpu


def _round_up(x, m):
    return ((x + m - 1) // m) * m


def _pick_col_tile(hidden_pad, target):
    """Largest multiple of 128 that divides hidden_pad and is <= target."""
    best = 128
    for cand in range(128, min(target, hidden_pad) + 1, 128):
        if hidden_pad % cand == 0:
            best = cand
    return best


# ----------------------------------------------------------------------------
# Fused kernel: sinusoidal embedding -> linear_1 -> SiLU -> linear_2
# Grid: (row tiles i, Linear2 output-column tiles j); j is fastest / arbitrary.
#   t      : (tm, 1)              timesteps for this row tile (f32)
#   freqs  : (1, half_pad)        frequency table (f32, grid-invariant)
#   w1s    : (half_pad, hid_pad)  rows of W1.T multiplying sin(emb)   (bf16)
#   w1c    : (half_pad, hid_pad)  rows of W1.T multiplying cos(emb)   (bf16)
#   b1     : (1, hid_pad)         f32, grid-invariant
#   w2     : (hid_pad, tn)        column tile of W2.T                 (bf16)
#   b2     : (1, tn)              f32
#   o      : (tm, tn)
#   h      : (tm, hid_pad)        VMEM scratch holding SiLU(linear_1) (bf16)
# ----------------------------------------------------------------------------
def _timestep_embedding_kernel(
    t_ref, freqs_ref, w1s_ref, w1c_ref, b1_ref, w2_ref, b2_ref, o_ref, h_ref
):
    j = pl.program_id(1)

    # Linear1 + SiLU only once per row tile; reused for every column tile j.
    @pl.when(j == 0)
    def _():
        t = t_ref[...]                              # (tm, 1) f32
        emb = t * freqs_ref[...]                    # (tm, half_pad) f32
        sin_e = jnp.sin(emb).astype(w1s_ref.dtype)  # bf16 -> single-pass MXU
        cos_e = jnp.cos(emb).astype(w1c_ref.dtype)

        # [sin | cos] @ W1.T  ==  sin @ W1s + cos @ W1c   (no lane concat)
        h = (
            jnp.dot(sin_e, w1s_ref[...], preferred_element_type=jnp.float32)
            + jnp.dot(cos_e, w1c_ref[...], preferred_element_type=jnp.float32)
            + b1_ref[...]
        )                                           # (tm, hid_pad) f32
        # SiLU in f32 (sigmoid goes to the EUP transcendental slot).
        h = h * jax.nn.sigmoid(h)
        h_ref[...] = h.astype(h_ref.dtype)

    # Linear2 column tile: (tm, hid_pad) @ (hid_pad, tn), f32 accumulation.
    out = (
        jnp.dot(h_ref[...], w2_ref[...], preferred_element_type=jnp.float32)
        + b2_ref[...]
    )
    o_ref[...] = out.astype(o_ref.dtype)


# ----------------------------------------------------------------------------
# Wrapper
# ----------------------------------------------------------------------------
def timestep_embedding_forward(
    timesteps,
    w1,  # (hidden, in_channels)  like nn.Linear.weight
    b1,  # (hidden,)
    w2,  # (hidden, hidden)
    b2,  # (hidden,)
    *,
    downscale_freq_shift=1.0,
    max_period=10000,
    block_rows=256,     # 256-wide MXU on v6e/v7x; small B collapses to 8
    block_cols=512,     # Linear2 output-column tile target
    weight_dtype=jnp.bfloat16,
):
    hidden, in_channels = w1.shape
    B = timesteps.shape[0]
    half = in_channels // 2

    half_pad = _round_up(half, 128)
    hidden_pad = _round_up(hidden, 128)

    # Static sinusoidal frequency table (tiny, computed once in the wrapper).
    # TODO(synk): half == downscale_freq_shift divides by zero, same as the
    # reference module; no extra guard added to keep semantics identical.
    exponent = -math.log(max_period) * jnp.arange(half, dtype=jnp.float32)
    exponent = exponent / (half - downscale_freq_shift)
    freqs = jnp.exp(exponent)
    freqs = jnp.pad(freqs, (0, half_pad - half))[None, :]        # (1, half_pad)

    # Pre-transpose once (no in-kernel XLU transpose), split sin/cos halves,
    # zero-pad to lane-aligned shapes, and store as bf16 (f32 accumulation in
    # the kernel).  Reference zero-pads the embedding for odd in_channels,
    # which is equivalent to dropping the corresponding W1 input row.
    w1t = jnp.transpose(w1).astype(jnp.float32)                  # (in, hidden)
    w1s = jnp.pad(
        w1t[:half, :], ((0, half_pad - half), (0, hidden_pad - hidden))
    ).astype(weight_dtype)
    w1c = jnp.pad(
        w1t[half:2 * half, :], ((0, half_pad - half), (0, hidden_pad - hidden))
    ).astype(weight_dtype)
    w2t = jnp.pad(
        jnp.transpose(w2).astype(jnp.float32),
        ((0, hidden_pad - hidden), (0, hidden_pad - hidden)),
    ).astype(weight_dtype)
    b1r = jnp.pad(b1.astype(jnp.float32), (0, hidden_pad - hidden)).reshape(
        1, hidden_pad
    )
    b2r = jnp.pad(b2.astype(jnp.float32), (0, hidden_pad - hidden)).reshape(
        1, hidden_pad
    )

    # Sublane-aligned row tile; pad batch up to a multiple of the tile.
    tm = min(block_rows, _round_up(B, 8))
    tm = _round_up(tm, 8)
    B_pad = _round_up(B, tm)
    t_pad = jnp.pad(timesteps.astype(jnp.float32), (0, B_pad - B))[:, None]

    # Linear2 output-column tile.
    tn = _pick_col_tile(hidden_pad, block_cols)

    grid = (B_pad // tm, hidden_pad // tn)

    wbytes = jnp.dtype(weight_dtype).itemsize
    flops = 2 * B_pad * (2 * half_pad * hidden_pad + hidden_pad * hidden_pad)
    transcendentals = B_pad * (2 * half_pad + hidden_pad)
    bytes_accessed = (
        4 * (t_pad.size + freqs.size + b1r.size + b2r.size)
        + wbytes * (w1s.size + w1c.size + w2t.size)
        + 4 * B_pad * hidden_pad
    )

    # Grid-invariant operands: never re-DMA'd -> single buffer saves VMEM.
    const_buf = pl.Buffered(1)

    out = pl.pallas_call(
        _timestep_embedding_kernel,
        out_shape=jax.ShapeDtypeStruct((B_pad, hidden_pad), w1.dtype),
        grid=grid,
        in_specs=[
            pl.BlockSpec((tm, 1), lambda i, j: (i, 0)),            # timesteps
            pl.BlockSpec((1, half_pad), lambda i, j: (0, 0),
                         pipeline_mode=const_buf),                 # freqs
            pl.BlockSpec((half_pad, hidden_pad), lambda i, j: (0, 0),
                         pipeline_mode=const_buf),                 # W1 (sin)
            pl.BlockSpec((half_pad, hidden_pad), lambda i, j: (0, 0),
                         pipeline_mode=const_buf),                 # W1 (cos)
            pl.BlockSpec((1, hidden_pad), lambda i, j: (0, 0),
                         pipeline_mode=const_buf),                 # b1
            pl.BlockSpec((hidden_pad, tn), lambda i, j: (0, j)),   # W2.T tile
            pl.BlockSpec((1, tn), lambda i, j: (0, j)),            # b2 tile
        ],
        out_specs=pl.BlockSpec((tm, tn), lambda i, j: (i, j)),
        scratch_shapes=[pltpu.VMEM((tm, hidden_pad), weight_dtype)],  # h
        compiler_params=pltpu.CompilerParams(
            dimension_semantics=("parallel", "arbitrary"),
            vmem_limit_bytes=64 * 1024 * 1024,
        ),
        cost_estimate=pl.CostEstimate(
            flops=int(flops),
            transcendentals=int(transcendentals),
            bytes_accessed=int(bytes_accessed),
        ),
    )(t_pad, freqs, w1s, w1c, b1r, w2t, b2r)

    return out[:B, :hidden]


# ----------------------------------------------------------------------------
# References
# ----------------------------------------------------------------------------
def _reference_f32(timesteps, w1, b1, w2, b2, *, downscale_freq_shift=1.0,
                   max_period=10000):
    """Mirrors the PyTorch module in full f32."""
    hidden, in_channels = w1.shape
    half = in_channels // 2
    exponent = -math.log(max_period) * jnp.arange(half, dtype=jnp.float32)
    exponent = exponent / (half - downscale_freq_shift)
    emb = timesteps.astype(jnp.float32)[:, None] * jnp.exp(exponent)[None, :]
    emb = jnp.concatenate([jnp.sin(emb), jnp.cos(emb)], axis=-1)
    if in_channels % 2 == 1:
        emb = jnp.pad(emb, ((0, 0), (0, 1)))
    h = jnp.dot(emb, w1.T, precision=jax.lax.Precision.HIGHEST) + b1
    h = h * jax.nn.sigmoid(h)
    return jnp.dot(h, w2.T, precision=jax.lax.Precision.HIGHEST) + b2


def _reference_matched(timesteps, w1, b1, w2, b2, *, downscale_freq_shift=1.0,
                       max_period=10000, weight_dtype=jnp.bfloat16):
    """Same math with the kernel's bf16-weight / f32-accumulate numerics."""
    hidden, in_channels = w1.shape
    half = in_channels // 2
    exponent = -math.log(max_period) * jnp.arange(half, dtype=jnp.float32)
    exponent = exponent / (half - downscale_freq_shift)
    emb = timesteps.astype(jnp.float32)[:, None] * jnp.exp(exponent)[None, :]
    w1t = jnp.transpose(w1).astype(weight_dtype)
    h = (
        jnp.dot(jnp.sin(emb).astype(weight_dtype), w1t[:half],
                preferred_element_type=jnp.float32)
        + jnp.dot(jnp.cos(emb).astype(weight_dtype), w1t[half:2 * half],
                  preferred_element_type=jnp.float32)
        + b1.astype(jnp.float32)
    )
    h = h * jax.nn.sigmoid(h)
    out = (
        jnp.dot(h.astype(weight_dtype), jnp.transpose(w2).astype(weight_dtype),
                preferred_element_type=jnp.float32)
        + b2.astype(jnp.float32)
    )
    return out


if __name__ == "__main__":
    # Small shapes consistent with TimestepEmbedding: a batch of timesteps,
    # in_channels = sinusoidal embedding width, hidden = time_embed_dim.
    B, in_channels, hidden = 4, 64, 128

    key = jax.random.PRNGKey(0)
    kt, k1, k2, k3, k4 = jax.random.split(key, 5)
    timesteps = jax.random.randint(kt, (B,), 0, 1000).astype(jnp.float32)

    bound1 = 1.0 / math.sqrt(in_channels)
    w1 = jax.random.uniform(k1, (hidden, in_channels), dtype=jnp.float32,
                            minval=-bound1, maxval=bound1)
    b1 = jax.random.uniform(k2, (hidden,), dtype=jnp.float32,
                            minval=-bound1, maxval=bound1)
    bound2 = 1.0 / math.sqrt(hidden)
    w2 = jax.random.uniform(k3, (hidden, hidden), dtype=jnp.float32,
                            minval=-bound2, maxval=bound2)
    b2 = jax.random.uniform(k4, (hidden,), dtype=jnp.float32,
                            minval=-bound2, maxval=bound2)

    out = timestep_embedding_forward(timesteps, w1, b1, w2, b2)
    out = jax.block_until_ready(out)
    assert out.shape == (B, hidden)

    # Tight check against a reference with identical bf16-weight numerics.
    ref_m = _reference_matched(timesteps, w1, b1, w2, b2)
    assert jnp.allclose(out, ref_m, atol=2e-3, rtol=2e-3), (
        "mismatch vs bf16-matched reference")

    # Loose check against the full-f32 PyTorch-equivalent reference
    # (bf16 weight storage introduces ~1e-3-level absolute error here).
    ref_f = _reference_f32(timesteps, w1, b1, w2, b2)
    assert jnp.allclose(out, ref_f, atol=2e-2, rtol=2e-2), (
        "mismatch vs f32 reference")

    print("KERNEL_OK")
</pallas_src>

<mosaic_0001>
module attributes {stable_mosaic.version = 11 : i64} {
  func.func @_timestep_embedding_kernel(%arg0: i32, %arg1: i32, %arg2: memref<8x1xf32, #tpu.memory_space<vmem>>, %arg3: memref<1x128xf32, #tpu.memory_space<vmem>>, %arg4: memref<128x128xbf16, #tpu.memory_space<vmem>>, %arg5: memref<128x128xbf16, #tpu.memory_space<vmem>>, %arg6: memref<1x128xf32, #tpu.memory_space<vmem>>, %arg7: memref<128x128xbf16, #tpu.memory_space<vmem>>, %arg8: memref<1x128xf32, #tpu.memory_space<vmem>>, %arg9: memref<8x128xf32, #tpu.memory_space<vmem>>, %arg10: memref<8x128xbf16, #tpu.memory_space<vmem>>) attributes {dimension_semantics = [#tpu.dimension_semantics<parallel>, #tpu.dimension_semantics<arbitrary>], iteration_bounds = array<i64: 1, 1>, scalar_prefetch = 0 : i64, scratch_operands = 1 : i64, tpu.core_type = #tpu.core_type<tc>, window_params = [{transform_indices = @transform_0, window_bounds = array<i64: 8, 1>}, {pipeline_mode = #tpu.pipeline_mode<synchronous>, transform_indices = @transform_1, window_bounds = array<i64: 1, 128>}, {pipeline_mode = #tpu.pipeline_mode<synchronous>, transform_indices = @transform_2, window_bounds = array<i64: 128, 128>}, {pipeline_mode = #tpu.pipeline_mode<synchronous>, transform_indices = @transform_3, window_bounds = array<i64: 128, 128>}, {pipeline_mode = #tpu.pipeline_mode<synchronous>, transform_indices = @transform_4, window_bounds = array<i64: 1, 128>}, {transform_indices = @transform_5, window_bounds = array<i64: 128, 128>}, {transform_indices = @transform_6, window_bounds = array<i64: 1, 128>}, {transform_indices = @transform_7, window_bounds = array<i64: 8, 128>}]} {
    %c0_i32 = arith.constant 0 : i32
    %0 = arith.cmpi eq, %arg1, %c0_i32 : i32
    %1 = arith.extui %0 : i1 to i32
    %c0_i32_0 = arith.constant 0 : i32
    %2 = arith.cmpi ne, %1, %c0_i32_0 : i32
    scf.if %2 {
      %c0_8 = arith.constant 0 : index
      %c0_9 = arith.constant 0 : index
      %10 = vector.load %arg2[%c0_8, %c0_9] : memref<8x1xf32, #tpu.memory_space<vmem>>, vector<8x1xf32>
      %c0_10 = arith.constant 0 : index
      %c0_11 = arith.constant 0 : index
      %11 = vector.load %arg3[%c0_10, %c0_11] : memref<1x128xf32, #tpu.memory_space<vmem>>, vector<1x128xf32>
      %12 = vector.broadcast %10 : vector<8x1xf32> to vector<8x128xf32>
      %13 = vector.broadcast %11 : vector<1x128xf32> to vector<8x128xf32>
      %14 = arith.mulf %12, %13 : vector<8x128xf32>
      %15 = math.sin %14 : vector<8x128xf32>
      %16 = arith.truncf %15 : vector<8x128xf32> to vector<8x128xbf16>
      %17 = math.cos %14 : vector<8x128xf32>
      %18 = arith.truncf %17 : vector<8x128xf32> to vector<8x128xbf16>
      %c0_12 = arith.constant 0 : index
      %c0_13 = arith.constant 0 : index
      %19 = vector.load %arg4[%c0_12, %c0_13] : memref<128x128xbf16, #tpu.memory_space<vmem>>, vector<128x128xbf16>
      %cst_14 = arith.constant dense<0.000000e+00> : vector<8x128xf32>
      %20 = tpu.matmul %16, %19, %cst_14 {dimension_numbers = #tpu.dot_dimension_numbers<[1], [0], [0], [1], [0, 0, 1, 1], [], []>} : vector<8x128xbf16>, vector<128x128xbf16>, vector<8x128xf32> -> vector<8x128xf32>
      %c0_15 = arith.constant 0 : index
      %c0_16 = arith.constant 0 : index
      %21 = vector.load %arg5[%c0_15, %c0_16] : memref<128x128xbf16, #tpu.memory_space<vmem>>, vector<128x128xbf16>
      %cst_17 = arith.constant dense<0.000000e+00> : vector<8x128xf32>
      %22 = tpu.matmul %18, %21, %cst_17 {dimension_numbers = #tpu.dot_dimension_numbers<[1], [0], [0], [1], [0, 0, 1, 1], [], []>} : vector<8x128xbf16>, vector<128x128xbf16>, vector<8x128xf32> -> vector<8x128xf32>
      %23 = arith.addf %20, %22 : vector<8x128xf32>
      %c0_18 = arith.constant 0 : index
      %c0_19 = arith.constant 0 : index
      %24 = vector.load %arg6[%c0_18, %c0_19] : memref<1x128xf32, #tpu.memory_space<vmem>>, vector<1x128xf32>
      %25 = vector.broadcast %24 : vector<1x128xf32> to vector<8x128xf32>
      %26 = arith.addf %23, %25 : vector<8x128xf32>
      %27 = arith.negf %26 : vector<8x128xf32>
      %28 = math.exp %27 : vector<8x128xf32>
      %cst_20 = arith.constant 1.000000e+00 : f32
      %29 = vector.broadcast %cst_20 : f32 to vector<8x128xf32>
      %30 = arith.addf %29, %28 : vector<8x128xf32>
      %31 = arith.divf %29, %30 : vector<8x128xf32>
      %32 = arith.mulf %26, %31 : vector<8x128xf32>
      %33 = arith.truncf %32 : vector<8x128xf32> to vector<8x128xbf16>
      %c0_21 = arith.constant 0 : index
      %c0_22 = arith.constant 0 : index
      %34 = vector.load %arg10[%c0_21, %c0_22] : memref<8x128xbf16, #tpu.memory_space<vmem>>, vector<8x128xbf16>
      tpu.vector_store %arg10[%c0_21, %c0_22], %33 {strides = array<i32>} : memref<8x128xbf16, #tpu.memory_space<vmem>>, vector<8x128xbf16>,
    } else {
    }
    %c0 = arith.constant 0 : index
    %c0_1 = arith.constant 0 : index
    %3 = vector.load %arg10[%c0, %c0_1] : memref<8x128xbf16, #tpu.memory_space<vmem>>, vector<8x128xbf16>
    %c0_2 = arith.constant 0 : index
    %c0_3 = arith.constant 0 : index
    %4 = vector.load %arg7[%c0_2, %c0_3] : memref<128x128xbf16, #tpu.memory_space<vmem>>, vector<128x128xbf16>
    %cst = arith.constant dense<0.000000e+00> : vector<8x128xf32>
    %5 = tpu.matmul %3, %4, %cst {dimension_numbers = #tpu.dot_dimension_numbers<[1], [0], [0], [1], [0, 0, 1, 1], [], []>} : vector<8x128xbf16>, vector<128x128xbf16>, vector<8x128xf32> -> vector<8x128xf32>
    %c0_4 = arith.constant 0 : index
    %c0_5 = arith.constant 0 : index
    %6 = vector.load %arg8[%c0_4, %c0_5] : memref<1x128xf32, #tpu.memory_space<vmem>>, vector<1x128xf32>
    %7 = vector.broadcast %6 : vector<1x128xf32> to vector<8x128xf32>
    %8 = arith.addf %5, %7 : vector<8x128xf32>
    %c0_6 = arith.constant 0 : index
    %c0_7 = arith.constant 0 : index
    %9 = vector.load %arg9[%c0_6, %c0_7] : memref<8x128xf32, #tpu.memory_space<vmem>>, vector<8x128xf32>
    tpu.vector_store %arg9[%c0_6, %c0_7], %8 {strides = array<i32>} : memref<8x128xf32, #tpu.memory_space<vmem>>, vector<8x128xf32>,
    return
  }
  func.func @transform_0(%arg0: i32, %arg1: i32) -> (i32, i32) {
    %c0_i32 = arith.constant 0 : i32
    %c0_i32_0 = arith.constant 0 : i32
    return %arg0, %c0_i32 : i32, i32
  }
  func.func @transform_1(%arg0: i32, %arg1: i32) -> (i32, i32) {
    %c0_i32 = arith.constant 0 : i32
    %c0_i32_0 = arith.constant 0 : i32
    %c0_i32_1 = arith.constant 0 : i32
    return %c0_i32, %c0_i32_0 : i32, i32
  }
  func.func @transform_2(%arg0: i32, %arg1: i32) -> (i32, i32) {
    %c0_i32 = arith.constant 0 : i32
    %c0_i32_0 = arith.constant 0 : i32
    %c0_i32_1 = arith.constant 0 : i32
    return %c0_i32, %c0_i32_0 : i32, i32
  }
  func.func @transform_3(%arg0: i32, %arg1: i32) -> (i32, i32) {
    %c0_i32 = arith.constant 0 : i32
    %c0_i32_0 = arith.constant 0 : i32
    %c0_i32_1 = arith.constant 0 : i32
    return %c0_i32, %c0_i32_0 : i32, i32
  }
  func.func @transform_4(%arg0: i32, %arg1: i32) -> (i32, i32) {
    %c0_i32 = arith.constant 0 : i32
    %c0_i32_0 = arith.constant 0 : i32
    %c0_i32_1 = arith.constant 0 : i32
    return %c0_i32, %c0_i32_0 : i32, i32
  }
  func.func @transform_5(%arg0: i32, %arg1: i32) -> (i32, i32) {
    %c0_i32 = arith.constant 0 : i32
    %c0_i32_0 = arith.constant 0 : i32
    return %c0_i32, %arg1 : i32, i32
  }
  func.func @transform_6(%arg0: i32, %arg1: i32) -> (i32, i32) {
    %c0_i32 = arith.constant 0 : i32
    %c0_i32_0 = arith.constant 0 : i32
    return %c0_i32, %arg1 : i32, i32
  }
  func.func @transform_7(%arg0: i32, %arg1: i32) -> (i32, i32) {
    %c0_i32 = arith.constant 0 : i32
    return %arg0, %arg1 : i32, i32
  }
}

</mosaic_0001>

<bundles_post_ra>
// kernel: tpu_custom_call.1
= control target key start
LH: loop header
LB: loop body
LE: loop exit
PB: predicated region body
PF: predicated region fallthrough
CT: control target
= control target key end

     0   :  { %12 = vsyncpa [#allocation4], 0  ;;  %s1278_s0 = inlined_call_operand.hbm [shape: f32[8,1], index: 0, kind: input, shape index: {}]   ;;  %s1279_s1 = inlined_call_operand.hbm [shape: f32[1,128], index: 1, kind: input, shape index: {}]   ;;  %s1280_s2 = inlined_call_operand.hbm [shape: bf16[128,128], index: 2, kind: input, shape index: {}]   ;;  %s1281_s3 = inlined_call_operand.hbm [shape: bf16[128,128], index: 3, kind: input, shape index: {}]   ;;  %s1282_s4 = inlined_call_operand.hbm [shape: f32[1,128], index: 4, kind: input, shape index: {}]   ;;  %s1283_s5 = inlined_call_operand.hbm [shape: bf16[128,128], index: 5, kind: input, shape index: {}]   ;;  %s1284_s6 = inlined_call_operand.hbm [shape: f32[1,128], index: 6, kind: input, shape index: {}]   ;;  %s1285_s7 = inlined_call_operand.hbm [shape: f32[8,128], index: 7, kind: output, shape index: {}]  }
   0x1   :  { %13 = vsyncpa [#allocation7], 0 }
   0x2   :  { %14 = vsyncpa [#allocation10], 0 }
   0x3   :  { %15 = vsyncpa [#allocation13], 0 }
   0x4   :  { %16 = vsyncpa [#allocation5], 0  ;;  %s1063_s24 = smov [#allocation6]   ;;  %s877_s28 = scalar_lea.hbm %s1279_s1, 16 }
   0x5   :  { %s33_s25 = sshll.u32 %s1063_s24, 4  ;;  %p878_p0 = scmp.ne.s32.totalorder %s1279_s1, %s877_s28  ;;  %s34_s25 = int_to_ptr.vmem [resolvable:$true] %s33_s25 }
   0x6   :  { %p881_p1 = scmp.lt.u32.totalorder %s877_s28, %s1279_s1 }
   0x8   :  { %p883_p2 = pnand %p881_p1, %p878_p0 }
   0xa   :  { %886 = shalt.err (!%p883_p2)
}
   0xb   :  { %s887_s10 = scalar_lea.vmem %s34_s25, 16  ;;  %s891_s11 = scalar_lea.vmem %s34_s25, 32 }
   0xc   :  { %p888_p3 = scmp.ne.s32.totalorder %s34_s25, %s887_s10  ;;  %p892_p4 = scmp.lt.s32.totalorder %s34_s25, %s34_s25 }
   0xd   :  { %p893_p5 = scmp.lt.s32.totalorder %s891_s11, %s887_s10 }
   0xf   :  { %p894_p6 = por %p893_p5, %p892_p4 }
  0x11   :  { %p895_p7 = pnand %p894_p6, %p888_p3 }
  0x13   :  { %898 = shalt.err (!%p895_p7)
}
  0x14   :  { %36 = dma.hbm_to_vmem [thread:$0]  %s1279_s1, 16, %s34_s25, [#allocation7]  }
  0x15   :  { %s1064_s14 = smov [#allocation9]   ;;  %s1065_s16 = smov [#allocation12]  }
  0x16   :  { %s54_s15 = sshll.u32 %s1064_s14, 4  ;;  %s76_s17 = sshll.u32 %s1065_s16, 4  ;;  %s55_s15 = int_to_ptr.vmem [resolvable:$true] %s54_s15  ;;  %s77_s17 = int_to_ptr.vmem [resolvable:$true] %s76_s17 }
  0x17   :  { %s899_s20 = scalar_lea.hbm %s1281_s3, 1024 }
  0x18   :  { %p900_p8 = scmp.ne.s32.totalorder %s1281_s3, %s899_s20  ;;  %p903_p9 = scmp.lt.u32.totalorder %s899_s20, %s1281_s3 }
  0x1a   :  { %p905_p10 = pnand %p903_p9, %p900_p8 }
  0x1c   :  { %908 = shalt.err (!%p905_p10)
}
  0x1d   :  { %s909_s1 = scalar_lea.vmem %s55_s15, 1024  ;;  %p914_p12 = scmp.lt.s32.totalorder %s55_s15, %s55_s15 }
  0x1e   :  { %p910_p11 = scmp.ne.s32.totalorder %s55_s15, %s909_s1  ;;  %p915_p13 = scmp.lt.s32.totalorder %s909_s1, %s909_s1 }
  0x20   :  { %p916_p0 = por %p915_p13, %p914_p12 }
  0x22   :  { %p917_p1 = pnand %p916_p0, %p910_p11 }
  0x24   :  { %920 = shalt.err (!%p917_p1)
}
  0x25   :  { %s1066_s25 = smov 64   ;;  %s1067_s26 = smov 4  }
  0x26   :  { %60 = dma.hbm_to_vmem [thread:$0]  %s1281_s3, 1024, %s55_s15, [#allocation10], %s1066_s25, %s1066_s25, %s1067_s26  }
  0x27   :  { %s921_s8 = scalar_lea.hbm %s1283_s5, 1024 }
  0x28   :  { %p922_p2 = scmp.ne.s32.totalorder %s1283_s5, %s921_s8  ;;  %p925_p3 = scmp.lt.u32.totalorder %s921_s8, %s1283_s5 }
  0x2a   :  { %p927_p4 = pnand %p925_p3, %p922_p2 }
  0x2c   :  { %930 = shalt.err (!%p927_p4)
}
  0x2d   :  { %s931_s13 = scalar_lea.vmem %s77_s17, 1024  ;;  %p936_p6 = scmp.lt.s32.totalorder %s77_s17, %s77_s17 }
  0x2e   :  { %p932_p5 = scmp.ne.s32.totalorder %s77_s17, %s931_s13  ;;  %p937_p7 = scmp.lt.s32.totalorder %s931_s13, %s931_s13 }
  0x30   :  { %p938_p8 = por %p937_p7, %p936_p6 }
  0x32   :  { %p939_p9 = pnand %p938_p8, %p932_p5 }
  0x34   :  { %942 = shalt.err (!%p939_p9)
}
  0x35   :  { %82 = dma.hbm_to_vmem [thread:$0]  %s1283_s5, 1024, %s77_s17, [#allocation13], %s1066_s25, %s1066_s25, %s1067_s26  }
  0x36   :  { %s1068_s15 = smov [#allocation3]   ;;  %s1069_s18 = smov [#allocation8]  }
  0x37   :  { %s23_s16 = sshll.u32 %s1068_s15, 4  ;;  %s42_s19 = sshll.u32 %s1069_s18, 4  ;;  %s24_s16 = int_to_ptr.vmem [resolvable:$true] %s23_s16  ;;  %s43_s19 = int_to_ptr.vmem [resolvable:$true] %s42_s19 }
  0x38   :  { %s943_s22 = scalar_lea.hbm %s1278_s0, 128 }
  0x39   :  { %p944_p10 = scmp.ne.s32.totalorder %s1278_s0, %s943_s22  ;;  %p947_p11 = scmp.lt.u32.totalorder %s943_s22, %s1278_s0 }
  0x3b   :  { %p949_p12 = pnand %p947_p11, %p944_p10 }
  0x3d   :  { %952 = shalt.err (!%p949_p12)
}
  0x3e   :  { %s953_s5 = scalar_lea.vmem %s24_s16, 128  ;;  %p958_p0 = scmp.lt.s32.totalorder %s24_s16, %s24_s16 }
  0x3f   :  { %p954_p13 = scmp.ne.s32.totalorder %s24_s16, %s953_s5  ;;  %p959_p1 = scmp.lt.s32.totalorder %s953_s5, %s953_s5 }
  0x41   :  { %p960_p2 = por %p959_p1, %p958_p0 }
  0x43   :  { %p961_p3 = pnand %p960_p2, %p954_p13 }
  0x45   :  { %964 = shalt.err (!%p961_p3)
}
  0x46   :  { %26 = dma.hbm_to_vmem [thread:$0]  %s1278_s0, 128, %s24_s16, [#allocation4]  }
  0x47   :  { %s965_s8 = scalar_lea.hbm %s1280_s2, 1024 }
  0x48   :  { %p966_p4 = scmp.ne.s32.totalorder %s1280_s2, %s965_s8  ;;  %p969_p5 = scmp.lt.u32.totalorder %s965_s8, %s1280_s2 }
  0x4a   :  { %p971_p6 = pnand %p969_p5, %p966_p4 }
  0x4c   :  { %974 = shalt.err (!%p971_p6)
}
  0x4d   :  { %s975_s13 = scalar_lea.vmem %s43_s19, 1024  ;;  %p980_p8 = scmp.lt.s32.totalorder %s43_s19, %s43_s19 }
  0x4e   :  { %p976_p7 = scmp.ne.s32.totalorder %s43_s19, %s975_s13  ;;  %p981_p9 = scmp.lt.s32.totalorder %s975_s13, %s975_s13 }
  0x50   :  { %p982_p10 = por %p981_p9, %p980_p8 }
  0x52   :  { %p983_p11 = pnand %p982_p10, %p976_p7 }
  0x54   :  { %986 = shalt.err (!%p983_p11)
}
  0x55   :  { %48 = dma.hbm_to_vmem [thread:$0]  %s1280_s2, 1024, %s43_s19, [#allocation7], %s1066_s25, %s1066_s25, %s1067_s26  }
  0x56   :  { %s1070_s14 = smov [#allocation11]   ;;  %s1071_s16 = smov [#allocation14]  }
  0x57   :  { %s67_s15 = sshll.u32 %s1070_s14, 4  ;;  %s89_s18 = sshll.u32 %s1071_s16, 4  ;;  %s68_s15 = int_to_ptr.vmem [resolvable:$true] %s67_s15  ;;  %s90_s18 = int_to_ptr.vmem [resolvable:$true] %s89_s18 }
  0x58   :  { %s987_s22 = scalar_lea.hbm %s1282_s4, 16 }
  0x59   :  { %p988_p12 = scmp.ne.s32.totalorder %s1282_s4, %s987_s22  ;;  %p991_p13 = scmp.lt.u32.totalorder %s987_s22, %s1282_s4 }
  0x5b   :  { %p993_p0 = pnand %p991_p13, %p988_p12 }
  0x5d   :  { %996 = shalt.err (!%p993_p0)
}
  0x5e   :  { %s997_s2 = scalar_lea.vmem %s68_s15, 16  ;;  %s1001_s25 = scalar_lea.vmem %s68_s15, 32 }
  0x5f   :  { %p998_p1 = scmp.ne.s32.totalorder %s68_s15, %s997_s2  ;;  %p1002_p2 = scmp.lt.s32.totalorder %s68_s15, %s68_s15 }
  0x60   :  { %p1003_p3 = scmp.lt.s32.totalorder %s1001_s25, %s997_s2 }
  0x62   :  { %p1004_p4 = por %p1003_p3, %p1002_p2 }
  0x64   :  { %p1005_p5 = pnand %p1004_p4, %p998_p1 }
  0x66   :  { %1008 = shalt.err (!%p1005_p5)
}
  0x67   :  { %70 = dma.hbm_to_vmem [thread:$0]  %s1282_s4, 16, %s68_s15, [#allocation10]  }
  0x68   :  { %s1009_s28 = scalar_lea.hbm %s1284_s6, 16 }
  0x69   :  { %p1010_p6 = scmp.ne.s32.totalorder %s1284_s6, %s1009_s28  ;;  %p1013_p7 = scmp.lt.u32.totalorder %s1009_s28, %s1284_s6 }
  0x6b   :  { %p1015_p8 = pnand %p1013_p7, %p1010_p6 }
  0x6d   :  { %1018 = shalt.err (!%p1015_p8)
}
  0x6e   :  { %s1019_s10 = scalar_lea.vmem %s90_s18, 16  ;;  %s1023_s11 = scalar_lea.vmem %s90_s18, 32 }
  0x6f   :  { %p1020_p9 = scmp.ne.s32.totalorder %s90_s18, %s1019_s10  ;;  %p1024_p10 = scmp.lt.s32.totalorder %s90_s18, %s90_s18 }
  0x70   :  { %p1025_p11 = scmp.lt.s32.totalorder %s1023_s11, %s1019_s10 }
  0x72   :  { %p1026_p12 = por %p1025_p11, %p1024_p10 }
  0x74   :  { %p1027_p13 = pnand %p1026_p12, %p1020_p9 }
  0x76   :  { %1030 = shalt.err (!%p1027_p13)
}
  0x77   :  { %92 = dma.hbm_to_vmem [thread:$0]  %s1284_s6, 16, %s90_s18, [#allocation13]  }
  0x78   :  { %1053 = dma.done.wait [#allocation4], 128  }
  0x79   :  { %1054 = vsyncadd [#allocation4], 4294967168 }
  0x7a   :  { %1055 = dma.done.wait [#allocation7], 1040  }
  0x7b   :  { %1056 = vsyncadd [#allocation7], 4294966256 }
  0x7c   :  { %1057 = dma.done.wait [#allocation10], 1040  }
  0x7d   :  { %1058 = vsyncadd [#allocation10], 4294966256 }
  0x7e   :  { %1059 = dma.done.wait [#allocation13], 1040  }
  0x7f   :  { %1060 = vsyncadd [#allocation13], 4294966256  ;;  %v1072_v0 = vmov 0   ;;  %v119_v1 = vld [vmem:[#allocation3] sm:$0xff]  ;;  %v845_v2 = vld [vmem:[#allocation9] sm:$0xff]   ;;  %v1073_v4 = vmov 0.0  }
  0x80   :  { %844 = vset.pattern.permute.xlu0 %v1072_v0  ;;  %v846_v3 = vld [vmem:[#allocation8] sm:$0xff]   ;;  %761 = vmatprep.subr.bf16.mxu0 %v1073_v4  ;;  %v847_v5 = vld [vmem:[#allocation9 + $0x8] sm:$0xff]   ;;  %v849_v7 = vld [vmem:[#allocation9 + $0x10] sm:$0xff]   ;;  %vm1074_vm0 = vmmov 0   ;;  %v1075_v32 = vmov 683565275  }
  0x81   :  { %123 = vperm.xlu0 %844, %v119_v1   ;;  %781 = vmatprep.subr.bf16.mxu1 %v1073_v4  ;;  %v848_v6 = vld [vmem:[#allocation8 + $0x8] sm:$0xff]   ;;  %v850_v8 = vld [vmem:[#allocation8 + $0x10] sm:$0xff]   ;;  %v851_v9 = vld [vmem:[#allocation9 + $0x18] sm:$0xff]   ;;  %v1076_v34 = vmov 2475754826   ;;  %s1081_s6 = smov [#allocation15]  }
  0x82   :  { %762 = vmatpush3.bf16.msra.mxu0 %v845_v2  ;;  %782 = vmatpush3.bf16.msra.mxu1 %v846_v3  ;;  %v852_v10 = vld [vmem:[#allocation8 + $0x18] sm:$0xff]   ;;  %v853_v11 = vld [vmem:[#allocation9 + $0x20] sm:$0xff]   ;;  %v855_v13 = vld [vmem:[#allocation9 + $0x28] sm:$0xff]   ;;  %v1077_v37 = vmov 2131351028   ;;  %s686_s13 = sshll.u32 %s1081_s6, 4  ;;  %s687_s13 = int_to_ptr.vmem [resolvable:$true] %s686_s13 }
  0x83   :  { %763 = vmatprep.subr.bf16.mxu0 %v1073_v4  ;;  %783 = vmatprep.subr.bf16.mxu1 %v1073_v4  ;;  %v854_v12 = vld [vmem:[#allocation8 + $0x20] sm:$0xff]   ;;  %v856_v14 = vld [vmem:[#allocation8 + $0x28] sm:$0xff]   ;;  %v857_v15 = vld [vmem:[#allocation9 + $0x30] sm:$0xff]   ;;  %v1078_v40 = vmov 2102212464   ;;  %s1031_s0 = scalar_lea.vmem %s687_s13, 128  ;;  %p1036_p1 = scmp.lt.s32.totalorder %s687_s13, %s687_s13 }
  0x84   :  { %777 = vmatprep.mubr.msk.bf16.mxu0 %vm1074_vm0, %v1073_v4  ;;  %797 = vmatprep.mubr.msk.bf16.mxu1 %vm1074_vm0, %v1073_v4  ;;  %v858_v16 = vld [vmem:[#allocation8 + $0x30] sm:$0xff]   ;;  %v859_v17 = vld [vmem:[#allocation9 + $0x38] sm:$0xff]   ;;  %v1079_v43 = vmov 920167782   ;;  %v1080_v46 = vmov 1326507024   ;;  %p1032_p0 = scmp.ne.s32.totalorder %s687_s13, %s1031_s0  ;;  %p1037_p2 = scmp.lt.s32.totalorder %s1031_s0, %s1031_s0 }
  0x85   :  { %v860_v18 = vld [vmem:[#allocation8 + $0x38] sm:$0xff]  }
  0x86   :  { %764 = vmatpush3.bf16.msra.mxu0 %v847_v5  ;;  %784 = vmatpush3.bf16.msra.mxu1 %v848_v6  ;;  %v698_v19 = vld [vmem:[#allocation6] ss:$0 sm:$0xff]  ;;  %p1038_p3 = por %p1037_p2, %p1036_p1 }
  0x87   :  { %765 = vmatprep.subr.bf16.mxu0 %v1073_v4  ;;  %785 = vmatprep.subr.bf16.mxu1 %v1073_v4 }
  0x88   :  { %p1039_p4 = pnand %p1038_p3, %p1032_p0 }
  0x8a   :  { %766 = vmatpush3.bf16.msra.mxu0 %v849_v7  ;;  %786 = vmatpush3.bf16.msra.mxu1 %v850_v8 }
  0x8b   :  { %767 = vmatprep.subr.bf16.mxu0 %v1073_v4  ;;  %787 = vmatprep.subr.bf16.mxu1 %v1073_v4 }
  0x8e   :  { %768 = vmatpush3.bf16.msra.mxu0 %v851_v9  ;;  %788 = vmatpush3.bf16.msra.mxu1 %v852_v10 }
  0x8f   :  { %769 = vmatprep.subr.bf16.mxu0 %v1073_v4  ;;  %789 = vmatprep.subr.bf16.mxu1 %v1073_v4 }
  0x92   :  { %770 = vmatpush3.bf16.msra.mxu0 %v853_v11  ;;  %790 = vmatpush3.bf16.msra.mxu1 %v854_v12 }
  0x93   :  { %771 = vmatprep.subr.bf16.mxu0 %v1073_v4  ;;  %791 = vmatprep.subr.bf16.mxu1 %v1073_v4 }
  0x96   :  { %772 = vmatpush3.bf16.msra.mxu0 %v855_v13  ;;  %792 = vmatpush3.bf16.msra.mxu1 %v856_v14 }
  0x97   :  { %773 = vmatprep.subr.bf16.mxu0 %v1073_v4  ;;  %793 = vmatprep.subr.bf16.mxu1 %v1073_v4 }
  0x9a   :  { %774 = vmatpush3.bf16.msra.mxu0 %v857_v15  ;;  %794 = vmatpush3.bf16.msra.mxu1 %v858_v16 }
  0x9b   :  { %775 = vmatprep.subr.bf16.mxu0 %v1073_v4  ;;  %795 = vmatprep.subr.bf16.mxu1 %v1073_v4 }
  0x9e   :  { %776 = vmatpush3.bf16.msra.mxu0 %v859_v17  ;;  %796 = vmatpush3.bf16.msra.mxu1 %v860_v18 }
  0x9f   :  { %801 = vmatprep.subr.bf16.mxu0 %v1073_v4 }
 0x100   :  { %v124_v20 = vpop.permute.xlu0 %123 }
 0x101   :  { %v1236_v21 = vmul.f32 %v698_v19, %v124_v20 }
 0x103   :  { %v136_v22 = vand.u32 2139095040, %v1236_v21  ;;  %v133_v26 = vand.u32 2147483647, %v1236_v21  ;;  %vm135_vm8 = vcmp.lt.s32.totalorder %v1236_v21, 0 }
 0x105   :  { %v137_v23 = vshrl.u32 %v136_v22, 23  ;;  %v140_v29 = vand.u32 8388607, %v133_v26  ;;  %vm134_vm9 = vcmp.le.f32.partialorder %v133_v26, 0.7853982 }
 0x107   :  { %v699_v24 = vadd.s32 4294967169, %v137_v23  ;;  %v141_v48 = vor.u32 8388608, %v140_v29 }
 0x109   :  { %v143_v25 = vadd.s32 1, %v699_v24  ;;  %v181_v62 = vshll.u32 %v141_v48, 8 }
 0x10b   :  { %vm144_vm1 = vcmp.gt.s32.totalorder %v143_v25, 0 }
 0x10c   :  { %v145_v27 = vsel %vm144_vm1, %v143_v25, 0  ;;  %vm225_vm1 = vweird.f32 %v1236_v21 }
 0x10d   :  { %v147_v28 = vand.u32 31, %v145_v27  ;;  %v146_v31 = vshrl.u32 %v145_v27, 5 }
 0x10f   :  { %v148_v30 = vsub.s32 32, %v147_v28  ;;  %v150_v33 = vshll.u32 %v1075_v32, %v147_v28  ;;  %v153_v35 = vshll.u32 %v1076_v34, %v147_v28  ;;  %v156_v39 = vshll.u32 %v1077_v37, %v147_v28 }
 0x110   :  { %v159_v42 = vshll.u32 %v1078_v40, %v147_v28  ;;  %v162_v45 = vshll.u32 %v1079_v43, %v147_v28  ;;  %vm165_vm2 = vcmp.lt.s32.totalorder %v146_v31, 1  ;;  %vm168_vm3 = vcmp.lt.s32.totalorder %v146_v31, 4 }
 0x111   :  { %v151_v36 = vshrl.u32 %v1076_v34, %v148_v30  ;;  %v154_v38 = vshrl.u32 %v1077_v37, %v148_v30  ;;  %v157_v41 = vshrl.u32 %v1078_v40, %v148_v30  ;;  %v160_v44 = vshrl.u32 %v1079_v43, %v148_v30 }
 0x112   :  { %v163_v47 = vshrl.u32 %v1080_v46, %v148_v30  ;;  %v149_v57 = vshrl.u32 %v1075_v32, %v148_v30  ;;  %vm167_vm4 = vcmp.lt.s32.totalorder %v146_v31, 3  ;;  %vm166_vm5 = vcmp.lt.s32.totalorder %v146_v31, 2 }
 0x113   :  { %v152_v49 = vor.u32 %v151_v36, %v150_v33  ;;  %v155_v50 = vor.u32 %v154_v38, %v153_v35  ;;  %v158_v51 = vor.u32 %v157_v41, %v156_v39  ;;  %v161_v52 = vor.u32 %v160_v44, %v159_v42 }
 0x114   :  { %v164_v53 = vor.u32 %v163_v47, %v162_v45 }
 0x115   :  { %v170_v54 = vsel %vm168_vm3, %v158_v51, 2102212464  ;;  %v173_v55 = vsel %vm165_vm2, %v152_v49, %v155_v50  ;;  %v177_v56 = vsel %vm165_vm2, %v155_v50, %v158_v51  ;;  %v174_v58 = vsel %vm168_vm3, %v161_v52, 920167782 }
 0x116   :  { %v178_v59 = vsel %vm168_vm3, %v164_v53, 1326507024  ;;  %v175_v60 = vsel %vm167_vm4, %v158_v51, %v174_v58  ;;  %v169_v63 = vsel %vm165_vm2, %v149_v57, %v152_v49  ;;  %v171_v0 = vsel %vm167_vm4, %v155_v50, %v170_v54  ;;  %v861_v58 = vld [vmem:[#allocation12] sm:$0xff]  }
 0x117   :  { %v179_v61 = vsel %vm167_vm4, %v161_v52, %v178_v59  ;;  %v176_v1 = vsel %vm166_vm5, %v173_v55, %v175_v60  ;;  %v172_v8 = vsel %vm166_vm5, %v169_v63, %v171_v0  ;;  %v862_v59 = vld [vmem:[#allocation12 + $0x8] sm:$0xff]   ;;  %v864_v60 = vld [vmem:[#allocation12 + $0x18] sm:$0xff]   ;;  %v867_v63 = vld [vmem:[#allocation12 + $0x30] sm:$0xff]  }
 0x118   :  { %v180_v2 = vsel %vm166_vm5, %v177_v56, %v179_v61  ;;  %v1245_v6 = vmul.u32.u64.low %v181_v62, %v176_v1  ;;  %v1246_v7 = vmul.u32.u64.high %v181_v62, %v176_v1, %v1245_v6  ;;  %v188_v10 = vmul.u32 %v181_v62, %v172_v8  ;;  %v865_v61 = vld [vmem:[#allocation12 + $0x20] sm:$0xff]   ;;  %v868_v0 = vld [vmem:[#allocation12 + $0x38] sm:$0xff]  }
 0x119   :  { %v1242_v3 = vmul.u32.u64.low %v181_v62, %v180_v2  ;;  %v1243_v5 = vmul.u32.u64.high %v181_v62, %v180_v2, %v1242_v3  ;;  %v866_v62 = vld [vmem:[#allocation12 + $0x28] sm:$0xff]  }
 0x11a   :  { %v191_v9 = vadd.s32 1, %v1246_v7  ;;  %v723_v3 = vld [vmem:[#allocation11] ss:$0 sm:$0xff] }
 0x11b   :  { %vm190_vm6 = vc.u32 %v1243_v5, %v1245_v6  ;;  %v189_v23 = vadd.s32 %v1245_v6, %v1243_v5 }
 0x11c   :  { %v192_v11 = vsel %vm190_vm6, %v191_v9, %v1246_v7 }
 0x11d   :  { %v193_v12 = vadd.s32 %v192_v11, %v188_v10 }
 0x11f   :  { %v194_v13 = vadd.s32 536870912, %v193_v12 }
 0x121   :  { %v195_v14 = vshrl.u32 %v194_v13, 30 }
 0x123   :  { %v196_v15 = vshll.u32 %v195_v14, 30  ;;  %v219_v36 = vsub.s32 4, %v195_v14 }
 0x125   :  { %v197_v16 = vsub.s32 %v193_v12, %v196_v15  ;;  %v220_v39 = vsel %vm135_vm8, %v219_v36, %v195_v14 }
 0x126   :  { %v222_v41 = vsel %vm134_vm9, 0, %v220_v39 }
 0x127   :  { %v199_v17 = vsub.s32 0, %v197_v16  ;;  %v226_v42 = vadd.s32 3, %v222_v41  ;;  %v331_v43 = vand.u32 3, %v222_v41 }
 0x129   :  { %v700_v18 = vmin.u32 %v199_v17, %v197_v16  ;;  %v227_v44 = vand.u32 3, %v226_v42  ;;  %vm336_vm10 = vcmp.eq.s32.totalorder %v331_v43, 2  ;;  %vm333_vm12 = vcmp.eq.s32.totalorder %v331_v43, 0 }
 0x12a   :  { %vm332_vm14 = vcmp.lt.s32.totalorder %v331_v43, 2 }
 0x12b   :  { %v201_v19 = vclz %v700_v18  ;;  %vm232_vm11 = vcmp.eq.s32.totalorder %v227_v44, 2  ;;  %vm229_vm13 = vcmp.eq.s32.totalorder %v227_v44, 0  ;;  %vm228_vm15 = vcmp.lt.s32.totalorder %v227_v44, 2 }
 0x12d   :  { %v701_v20 = vadd.s32 4294967294, %v201_v19  ;;  %v725_v19 = vld [vmem:[#allocation14] ss:$0 sm:$0xff] }
 0x12f   :  { %vm702_vm7 = vcmp.lt.s32.totalorder %v701_v20, 0 }
 0x130   :  { %v204_v22 = vsel %vm702_vm7, 0, %v701_v20 }
 0x131   :  { %v205_v24 = vsub.s32 32, %v204_v22  ;;  %v209_v25 = vsub.s32 4294967266, %v204_v22  ;;  %v206_v27 = vshll.u32 %v197_v16, %v204_v22 }
 0x133   :  { %v207_v28 = vshrl.u32 %v189_v23, %v205_v24  ;;  %v210_v29 = vadd.s32 127, %v209_v25 }
 0x135   :  { %v208_v30 = vor.u32 %v207_v28, %v206_v27  ;;  %v211_v31 = vshll.u32 %v210_v29, 23 }
 0x137   :  { %v212_v32 = vor.u32 4788187, %v211_v31  ;;  %v215_v34 = vcvt.s32.f32 %v208_v30 }
 0x139   :  { %v213_v33 = vand.u32 2147483647, %v212_v32 }
 0x13b   :  { %v216_v35 = vmul.f32 %v215_v34, %v213_v33 }
 0x13d   :  { %v217_v37 = vxor.u32 2147483648, %v216_v35 }
 0x13f   :  { %v218_v38 = vsel %vm135_vm8, %v217_v37, %v216_v35 }
 0x140   :  { %v221_v40 = vsel %vm134_vm9, %v1236_v21, %v218_v38  ;;  %v863_v21 = vld [vmem:[#allocation12 + $0x10] sm:$0xff]  }
 0x141   :  { %869 = vcosq.f32 %v221_v40 }
 0x142   :  { %871 = vsinq.f32 %v221_v40 }
 0x14b   :  { %v870_v45 = vpop.eup %869 }
 0x14c   :  { %v872_v46 = vpop.eup %871  ;;  %v233_v47 = vxor.u32 2147483648, %v870_v45 }
 0x14d   :  { %v230_v48 = vxor.u32 2147483648, %v872_v46 }
 0x14e   :  { %v338_v49 = vsel %vm336_vm10, %v233_v47, %v872_v46  ;;  %v234_v26 = vsel %vm232_vm11, %v233_v47, %v872_v46 }
 0x14f   :  { %v335_v50 = vsel %vm333_vm12, %v870_v45, %v230_v48  ;;  %v231_v51 = vsel %vm229_vm13, %v870_v45, %v230_v48 }
 0x150   :  { %v339_v52 = vsel %vm332_vm14, %v335_v50, %v338_v49  ;;  %v235_v53 = vsel %vm228_vm15, %v231_v51, %v234_v26 }
 0x151   :  { %v340_v54 = vsel %vm225_vm1, nan, %v339_v52  ;;  %v236_v55 = vsel %vm225_vm1, nan, %v235_v53 }
 0x152   :  { %v341_v56 = vpack.c.bf16 %v340_v54, %v340_v54  ;;  %v237_v57 = vpack.c.bf16 %v236_v55, %v236_v55 }
 0x154   :  { %778 = vmatmul.mubr.bf16.vlgmr.msra.gmra.mrb[0].mxu0 %v341_v56  ;;  %798 = vmatmul.mubr.bf16.vlgmr.msra.gmra.mrb[0].mxu1 %v237_v57 }
 0x155   :  { %817 = vmatprep.mubr.msk.bf16.mxu0 %vm1074_vm0, %v1073_v4  ;;  %802 = vmatpush3.bf16.msra.mxu0 %v861_v58 }
 0x156   :  { %803 = vmatprep.subr.bf16.mxu0 %v1073_v4 }
 0x159   :  { %804 = vmatpush3.bf16.msra.mxu0 %v862_v59 }
 0x15a   :  { %805 = vmatprep.subr.bf16.mxu0 %v1073_v4 }
 0x15d   :  { %806 = vmatpush3.bf16.msra.mxu0 %v863_v21 }
 0x15e   :  { %807 = vmatprep.subr.bf16.mxu0 %v1073_v4 }
 0x161   :  { %808 = vmatpush3.bf16.msra.mxu0 %v864_v60 }
 0x162   :  { %809 = vmatprep.subr.bf16.mxu0 %v1073_v4 }
 0x165   :  { %810 = vmatpush3.bf16.msra.mxu0 %v865_v61 }
 0x166   :  { %811 = vmatprep.subr.bf16.mxu0 %v1073_v4 }
 0x169   :  { %812 = vmatpush3.bf16.msra.mxu0 %v866_v62 }
 0x16a   :  { %813 = vmatprep.subr.bf16.mxu0 %v1073_v4 }
 0x16d   :  { %814 = vmatpush3.bf16.msra.mxu0 %v867_v63 }
 0x16e   :  { %815 = vmatprep.subr.bf16.mxu0 %v1073_v4 }
 0x171   :  { %816 = vmatpush3.bf16.msra.mxu0 %v868_v0 }
 0x227   :  { %v456_v1 = vpop.f32.mrb[0].mxu0  ;;  %v544_v2 = vpop.f32.mrb[0].mxu1 }
 0x228   :  { %v545_v5 = vadd.f32 %v544_v2, %v456_v1  ;;  %v779_v6 = vpop.f32.mrb[1].mxu0  ;;  %v799_v7 = vpop.f32.mrb[1].mxu1 }
 0x229   :  { %v459_v8 = vpop.f32.mrb[2].mxu0  ;;  %v547_v9 = vpop.f32.mrb[2].mxu1 }
 0x22a   :  { %v557_v10 = vadd.f32 %v723_v3, %v545_v5  ;;  %v780_v11 = vpop.f32.mrb[3].mxu0  ;;  %v800_v12 = vpop.f32.mrb[3].mxu1 }
 0x22c   :  { %v724_v13 = vmul.f32 -1.442695, %v557_v10 }
 0x22e   :  { %873 = vpow2.f32 %v724_v13 }
 0x238   :  { %v874_v14 = vpop.eup %873 }
 0x239   :  { %v561_v15 = vadd.f32 1.0, %v874_v14 }
 0x23b   :  { %875 = vrcp.f32 %v561_v15 }
 0x245   :  { %v876_v16 = vpop.eup %875 }
 0x246   :  { %v564_v17 = vmul.f32 %v876_v16, %v557_v10 }
 0x248   :  { %v565_v4 = vpack.c.bf16 %v564_v17, %v564_v17 }
 0x24a   :  { %566 = vst [vmem:[#allocation2] sm:$0xf] %v565_v4 }
 0x251   :  { %v567_v18 = vld [vmem:[#allocation2] sm:$0xf] }
 0x252   :  { %818 = vmatmul.mubr.bf16.vlgmr.msra.gmra.mrb[4].mxu0 %v567_v18 }
 0x325   :  { %v673_v20 = vpop.f32.mrb[4].mxu0 }
 0x326   :  { %v674_v22 = vadd.f32 %v725_v19, %v673_v20  ;;  %v819_v23 = vpop.f32.mrb[5].mxu0 }
 0x327   :  { %v676_v24 = vpop.f32.mrb[6].mxu0 }
 0x328   :  { %679 = vst [vmem:[#allocation15] sm:$0xff] %v674_v22  ;;  %v820_v25 = vpop.f32.mrb[7].mxu0 }
 0x329   :  { %1042 = shalt.err (!%p1039_p4)
}
 0x32a   :  { %s1043_s15 = scalar_lea.hbm %s1285_s7, 128 }
 0x32b   :  { %p1044_p5 = scmp.ne.s32.totalorder %s1285_s7, %s1043_s15  ;;  %p1047_p6 = scmp.lt.u32.totalorder %s1043_s15, %s1285_s7 }
 0x32d   :  { %p1049_p7 = pnand %p1047_p6, %p1044_p5 }
 0x32f   :  { %1052 = shalt.err (!%p1049_p7)
}
 0x330   :  { %689 = dma.vmem_to_hbm [thread:$0]  %s687_s13, 128, %s1285_s7, [#allocation5]  }
 0x331   :  { %1061 = dma.done.wait [#allocation5], 128  }
 0x332   :  { %1062 = vsyncadd [#allocation5], 4294967168 }
 0x333   :  { %693 = vsyncpa [#allocation4], 1 }
 0x334   :  { %694 = vsyncpa [#allocation7], 1 }
 0x335   :  { %695 = vsyncpa [#allocation10], 1 }
 0x336   :  { %696 = vsyncpa [#allocation13], 1 }
 0x337   :  { %697 = vsyncpa [#allocation5], 1 }

</bundles_post_ra>
